<compile_context>
chip_gen: v6e
topology: v6e:2x2x1
jax: 0.10.0
libtpu: 0.0.40
codegen_flags: <defaults>
</compile_context>

<pallas_src>
import jax
import jax.numpy as jnp
from jax.experimental import pallas as pl
from jax.experimental.pallas import tpu as pltpu


def mlp_kernel(x_ref, w1_ref, b1_ref, w2_ref, b2_ref, o_ref):
    # ---- Layer1: Linear(input -> hidden) ------------------------------------
    h_pre = jnp.dot(x_ref[...], w1_ref[...],
                    preferred_element_type=jnp.float32) + b1_ref[...]
    # ---- Sigmoid: 1 / (1 + exp(-h)); reciprocal on the EUP (free slot) ------
    h = pl.reciprocal(1.0 + jnp.exp(-h_pre), approx=True)
    # ---- Layer2: Linear(hidden -> output_padded) ----------------------------
    logits = jnp.dot(h, w2_ref[...],
                     preferred_element_type=jnp.float32) + b2_ref[...]
    # ---- Softmax over the feature axis (last axis here). --------------------
    # Padded output lanes have bias -1e30 -> exp underflows to 0, so the
    # normalization over all 128 lanes equals the softmax over the real lanes.
    m = jnp.max(logits, axis=-1, keepdims=True)
    e = jnp.exp(logits - m)
    inv = pl.reciprocal(jnp.sum(e, axis=-1, keepdims=True), approx=True)
    o_ref[...] = (e * inv).astype(o_ref.dtype)


def mlp_forward(x, w1, b1, w2, b2, *, block_b=256):
    """x: (B, IN); w1: (IN, H); b1: (H,); w2: (H, O); b2: (O,)."""
    B, IN = x.shape
    H = w1.shape[1]
    O = w2.shape[1]

    LANE = 128
    O_pad = ((O + LANE - 1) // LANE) * LANE

    # Lane-dense output: pad W2 columns with zeros and the padded bias entries
    # with -1e30 so they vanish under the softmax.
    w2p = jnp.pad(w2, ((0, 0), (0, O_pad - O)))
    b2p = jnp.pad(b2.reshape(1, O), ((0, 0), (0, O_pad - O)),
                  constant_values=-1e30)
    b1r = b1.reshape(1, H)

    # Batch tiling: TB rows per grid step (weights stay VMEM-resident).
    TB = min(block_b, B)
    n_blocks = pl.cdiv(B, TB)
    B_pad = n_blocks * TB
    xp = x if B_pad == B else jnp.pad(x, ((0, B_pad - B), (0, 0)))

    flops = 2 * B_pad * (IN * H + H * O_pad)
    transcendentals = B_pad * (H + O_pad)          # exp in sigmoid + softmax
    bytes_accessed = 4 * (B_pad * IN + IN * H + H
                          + H * O_pad + O_pad + B_pad * O_pad)

    out = pl.pallas_call(
        mlp_kernel,
        out_shape=jax.ShapeDtypeStruct((B_pad, O_pad), jnp.float32),
        grid=(n_blocks,),
        in_specs=[
            pl.BlockSpec((TB, IN), lambda i: (i, 0)),      # x tile, pipelined
            pl.BlockSpec((IN, H), lambda i: (0, 0)),       # W1 resident
            pl.BlockSpec((1, H), lambda i: (0, 0)),        # b1 resident
            pl.BlockSpec((H, O_pad), lambda i: (0, 0)),    # W2 resident
            pl.BlockSpec((1, O_pad), lambda i: (0, 0)),    # b2 resident
        ],
        out_specs=pl.BlockSpec((TB, O_pad), lambda i: (i, 0)),
        compiler_params=pltpu.CompilerParams(
            dimension_semantics=("parallel",)),
        cost_estimate=pl.CostEstimate(
            flops=flops,
            transcendentals=transcendentals,
            bytes_accessed=bytes_accessed),
    )(xp, w1, b1r, w2p, b2p)

    return out[:B, :O]


if __name__ == "__main__":
    # Shapes consistent with the module's forward (big enough to exercise the
    # batch grid: 512 rows -> 2 grid steps of 256).
    batch, input_size, hidden_size, output_size = 512, 32, 32, 16

    key = jax.random.PRNGKey(0)
    kx, kw1, kb1, kw2, kb2 = jax.random.split(key, 5)

    x = jax.random.normal(kx, (batch, input_size), dtype=jnp.float32)
    # Deterministic parameter init (synthetic; not a checkpoint load).
    w1 = jax.random.normal(kw1, (input_size, hidden_size), dtype=jnp.float32) * 0.1
    b1 = jax.random.normal(kb1, (hidden_size,), dtype=jnp.float32) * 0.1
    w2 = jax.random.normal(kw2, (hidden_size, output_size), dtype=jnp.float32) * 0.1
    b2 = jax.random.normal(kb2, (output_size,), dtype=jnp.float32) * 0.1

    out = mlp_forward(x, w1, b1, w2, b2)
    jax.block_until_ready(out)

    # Sanity check against a pure-JAX reference (tolerance loosened slightly
    # because pl.reciprocal(approx=True) is ~2^-12 accurate).
    h_ref = jax.nn.sigmoid(x @ w1 + b1)
    ref = jax.nn.softmax(h_ref @ w2 + b2, axis=1)
    assert out.shape == (batch, output_size)
    assert jnp.allclose(out, ref, atol=3e-3, rtol=3e-3)

    print("KERNEL_OK")
</pallas_src>

<mosaic_0001>
module attributes {stable_mosaic.version = 11 : i64} {
  func.func @mlp_kernel(%arg0: i32, %arg1: memref<256x32xf32, #tpu.memory_space<vmem>>, %arg2: memref<32x32xf32, #tpu.memory_space<vmem>>, %arg3: memref<1x32xf32, #tpu.memory_space<vmem>>, %arg4: memref<32x128xf32, #tpu.memory_space<vmem>>, %arg5: memref<1x128xf32, #tpu.memory_space<vmem>>, %arg6: memref<256x128xf32, #tpu.memory_space<vmem>>) attributes {dimension_semantics = [#tpu.dimension_semantics<parallel>], iteration_bounds = array<i64: 2>, scalar_prefetch = 0 : i64, scratch_operands = 0 : i64, tpu.core_type = #tpu.core_type<tc>, window_params = [{transform_indices = @transform_0, window_bounds = array<i64: 256, 32>}, {pipeline_mode = #tpu.pipeline_mode<synchronous>, transform_indices = @transform_1, window_bounds = array<i64: 32, 32>}, {pipeline_mode = #tpu.pipeline_mode<synchronous>, transform_indices = @transform_2, window_bounds = array<i64: 1, 32>}, {pipeline_mode = #tpu.pipeline_mode<synchronous>, transform_indices = @transform_3, window_bounds = array<i64: 32, 128>}, {pipeline_mode = #tpu.pipeline_mode<synchronous>, transform_indices = @transform_4, window_bounds = array<i64: 1, 128>}, {transform_indices = @transform_5, window_bounds = array<i64: 256, 128>}]} {
    %c0 = arith.constant 0 : index
    %c0_0 = arith.constant 0 : index
    %0 = vector.load %arg1[%c0, %c0_0] : memref<256x32xf32, #tpu.memory_space<vmem>>, vector<256x32xf32>
    %c0_1 = arith.constant 0 : index
    %c0_2 = arith.constant 0 : index
    %1 = vector.load %arg2[%c0_1, %c0_2] : memref<32x32xf32, #tpu.memory_space<vmem>>, vector<32x32xf32>
    %cst = arith.constant dense<0.000000e+00> : vector<256x32xf32>
    %2 = tpu.matmul %0, %1, %cst {dimension_numbers = #tpu.dot_dimension_numbers<[1], [0], [0], [1], [0, 0, 1, 1], [], []>} : vector<256x32xf32>, vector<32x32xf32>, vector<256x32xf32> -> vector<256x32xf32>
    %c0_3 = arith.constant 0 : index
    %c0_4 = arith.constant 0 : index
    %3 = vector.load %arg3[%c0_3, %c0_4] : memref<1x32xf32, #tpu.memory_space<vmem>>, vector<1x32xf32>
    %4 = vector.broadcast %3 : vector<1x32xf32> to vector<256x32xf32>
    %5 = arith.addf %2, %4 : vector<256x32xf32>
    %cst_5 = arith.constant 0.000000e+00 : f32
    %6 = vector.broadcast %cst_5 : f32 to vector<256x32xf32>
    %7 = arith.subf %6, %5 : vector<256x32xf32>
    %8 = math.exp %7 : vector<256x32xf32>
    %cst_6 = arith.constant 1.000000e+00 : f32
    %9 = vector.broadcast %cst_6 : f32 to vector<256x32xf32>
    %10 = arith.addf %9, %8 : vector<256x32xf32>
    %11 = tpu.reciprocal %10 {approx = true} : vector<256x32xf32> -> vector<256x32xf32>
    %c0_7 = arith.constant 0 : index
    %c0_8 = arith.constant 0 : index
    %12 = vector.load %arg4[%c0_7, %c0_8] : memref<32x128xf32, #tpu.memory_space<vmem>>, vector<32x128xf32>
    %cst_9 = arith.constant dense<0.000000e+00> : vector<256x128xf32>
    %13 = tpu.matmul %11, %12, %cst_9 {dimension_numbers = #tpu.dot_dimension_numbers<[1], [0], [0], [1], [0, 0, 1, 1], [], []>} : vector<256x32xf32>, vector<32x128xf32>, vector<256x128xf32> -> vector<256x128xf32>
    %c0_10 = arith.constant 0 : index
    %c0_11 = arith.constant 0 : index
    %14 = vector.load %arg5[%c0_10, %c0_11] : memref<1x128xf32, #tpu.memory_space<vmem>>, vector<1x128xf32>
    %15 = vector.broadcast %14 : vector<1x128xf32> to vector<256x128xf32>
    %16 = arith.addf %13, %15 : vector<256x128xf32>
    %cst_12 = arith.constant dense<0xFF800000> : vector<256xf32>
    %17 = vector.multi_reduction <maximumf>, %16, %cst_12 [1] : vector<256x128xf32> to vector<256xf32>
    %18 = vector.shape_cast %17 : vector<256xf32> to vector<256x1xf32>
    %19 = vector.broadcast %18 : vector<256x1xf32> to vector<256x128xf32>
    %20 = arith.subf %16, %19 : vector<256x128xf32>
    %21 = math.exp %20 : vector<256x128xf32>
    %cst_13 = arith.constant dense<0.000000e+00> : vector<256xf32>
    %22 = vector.multi_reduction <add>, %21, %cst_13 [1] : vector<256x128xf32> to vector<256xf32>
    %23 = vector.shape_cast %22 : vector<256xf32> to vector<256x1xf32>
    %24 = tpu.reciprocal %23 {approx = true} : vector<256x1xf32> -> vector<256x1xf32>
    %25 = vector.broadcast %24 : vector<256x1xf32> to vector<256x128xf32>
    %26 = arith.mulf %21, %25 : vector<256x128xf32>
    %c0_14 = arith.constant 0 : index
    %c0_15 = arith.constant 0 : index
    %27 = vector.load %arg6[%c0_14, %c0_15] : memref<256x128xf32, #tpu.memory_space<vmem>>, vector<256x128xf32>
    tpu.vector_store %arg6[%c0_14, %c0_15], %26 {strides = array<i32>} : memref<256x128xf32, #tpu.memory_space<vmem>>, vector<256x128xf32>,
    return
  }
  func.func @transform_0(%arg0: i32) -> (i32, i32) {
    %c0_i32 = arith.constant 0 : i32
    %c0_i32_0 = arith.constant 0 : i32
    return %arg0, %c0_i32 : i32, i32
  }
  func.func @transform_1(%arg0: i32) -> (i32, i32) {
    %c0_i32 = arith.constant 0 : i32
    %c0_i32_0 = arith.constant 0 : i32
    %c0_i32_1 = arith.constant 0 : i32
    return %c0_i32, %c0_i32_0 : i32, i32
  }
  func.func @transform_2(%arg0: i32) -> (i32, i32) {
    %c0_i32 = arith.constant 0 : i32
    %c0_i32_0 = arith.constant 0 : i32
    %c0_i32_1 = arith.constant 0 : i32
    return %c0_i32, %c0_i32_0 : i32, i32
  }
  func.func @transform_3(%arg0: i32) -> (i32, i32) {
    %c0_i32 = arith.constant 0 : i32
    %c0_i32_0 = arith.constant 0 : i32
    %c0_i32_1 = arith.constant 0 : i32
    return %c0_i32, %c0_i32_0 : i32, i32
  }
  func.func @transform_4(%arg0: i32) -> (i32, i32) {
    %c0_i32 = arith.constant 0 : i32
    %c0_i32_0 = arith.constant 0 : i32
    %c0_i32_1 = arith.constant 0 : i32
    return %c0_i32, %c0_i32_0 : i32, i32
  }
  func.func @transform_5(%arg0: i32) -> (i32, i32) {
    %c0_i32 = arith.constant 0 : i32
    %c0_i32_0 = arith.constant 0 : i32
    return %arg0, %c0_i32 : i32, i32
  }
}

</mosaic_0001>

<bundles_post_ra>
// kernel: tpu_custom_call.1
= control target key start
LH: loop header
LB: loop body
LE: loop exit
PB: predicated region body
PF: predicated region fallthrough
CT: control target
= control target key end

     0   :  { %10 = vsyncpa [#allocation3], 0  ;;  %s2726_s0 = inlined_call_operand.vmem [shape: f32[512,32], index: 0, kind: input, shape index: {}]   ;;  %s2727_s1 = inlined_call_operand.vmem [shape: f32[32,32], index: 1, kind: input, shape index: {}]   ;;  %s2728_s2 = inlined_call_operand.vmem [shape: f32[1,32], index: 2, kind: input, shape index: {}]   ;;  %s2729_s3 = inlined_call_operand.vmem [shape: f32[32,128], index: 3, kind: input, shape index: {}]   ;;  %s2730_s4 = inlined_call_operand.vmem [shape: f32[1,128], index: 4, kind: input, shape index: {}]   ;;  %s2731_s5 = inlined_call_operand.hbm [shape: f32[512,128], index: 5, kind: output, shape index: {}]  }
   0x1   :  { %12 = vsyncpa [#allocation3 + $0x1], 0  ;;  %s2134_s18 = smov 0   ;;  %s2136_s19 = smov 0  }
   0x2   :  { %s2138_s20 = smov 0   ;;  %s2140_s21 = smov 0  }
   0x3 LB: > { %s2155_s22 = sadd.s32 4294967295, %s2099_s21   ;;  %s1479_s23 = sadd.s32 4294967294, %s2099_s21   ;;  %s2099_s21 = sphi %s2140_s21, %s2737_s21   ;;  %s2095_s20 = sphi %s2138_s20, %s2736_s20   ;;  %s2091_s19 = sphi %s2136_s19, %s2735_s19   ;;  %s2087_s18 = sphi %s2134_s18, %s2734_s18  }
   0x4   : > { %s2159_s24 = sadd.s32 1, %s2099_s21   ;;  %s135_s25 = sadd.s32 1, %s2095_s20 }
   0x5   : > { %s132_s26 = ssub.s32 %s2099_s21, %s2159_s24  ;;  %p145_p0 = scmp.ne.s32.totalorder %s2095_s20, %s2091_s19 }
   0x6   : > { %p133_p1 = scmp.eq.s32.totalorder %s132_s26, 0  ;;  %p146_p2 = scmp.eq.s32.totalorder %s2155_s22, 1 }
   0x7   : > { %p151_p3 = scmp.ne.s32.totalorder %s2091_s19, %s2087_s18  ;;  %p152_p4 = scmp.eq.s32.totalorder %s1479_s23, 1 }
   0x8   : > { %s2170_s27 = scalar_select %p133_p1, %s2095_s20, %s135_s25  }
   0x9   : > { %p2172_p5 = por %p146_p2, %p145_p0  ;;  %p2176_p6 = por %p152_p4, %p151_p3 }
   0xa   : > { %p1482_p7 = scmp.ge.s32.totalorder %s2099_s21, 1  ;;  %p191_p8 = scmp.lt.s32.totalorder %s2099_s21, 3 }
   0xc   : > { %p192_p9 = pnand %p1482_p7, %p191_p8 }
   0xd   : > { %s1484_s9 = sshll.u32 (!%p192_p9), %s2155_s22, 5  ;;  %s2101_s7 = smov (!%p192_p9), [#allocation2]  }
   0xe   : > { %195 = sbr.rel (%p192_p9) target bundleno = 845 (0x34d), region = 40  ;;  %p220_p10 = scmp.lt.s32.totalorder (!%p192_p9), %s1484_s9, 63 }
   0xf   : > { %s2043_s8 = sshll.u32 (!%p192_p9), %s2101_s7, 4  ;;  %s2044_s8 = int_to_ptr.vmem [resolvable:$false] %s2043_s8 }
  0x13   : > { %v261_v0 = vld [vmem:[%s2727_s1 + $0x18] sm:$0xff]  ;;  %v260_v1 = vld [vmem:[%s2727_s1 + $0x10] sm:$0xff]  ;;  %v259_v2 = vld [vmem:[%s2727_s1 + $0x8] sm:$0xff]  ;;  %s2739_s9 = smov (!%p220_p10, %s1484_s9), 63  ;;  %vm269_vm0 = vcmask 261120  }
  0x14   : > { %1630 = vmatprep.subr.mxu0 %v261_v0  ;;  %v258_v3 = vld [vmem:[%s2727_s1] sm:$0xff]  ;;  %s1485_s14 = sshll.u32 %s2739_s9, 3  ;;  %v754_v36 = vld [vmem:[%s2729_s3 + $0x18] sm:$0xff]  ;;  %v753_v37 = vld [vmem:[%s2729_s3 + $0x10] sm:$0xff]  ;;  %s2045_s9 = scalar_lea.vmem %s2044_s8, 8192 }
  0x15   : > { %1631 = vmatpush3.msra.mxu0 %v261_v0  ;;  %s2198_s17 = scalar_lea.vmem %s2726_s0, %s1485_s14  ;;  %1686 = vmatprep.subr.mxu1 %v754_v36  ;;  %v752_v38 = vld [vmem:[%s2729_s3 + $0x8] sm:$0xff]  ;;  %v751_v39 = vld [vmem:[%s2729_s3] sm:$0xff]  ;;  %s216_s14 = sand.u32 1, %s2091_s19  }
  0x16   : > { %1632 = vmatprep.subr.mxu0 %v260_v1  ;;  %v226_v4 = vld [vmem:[%s2198_s17] sm:$0xff]  ;;  %v227_v5 = vld [vmem:[%s2198_s17 + $0x8] sm:$0xff]  ;;  %v228_v6 = vld [vmem:[%s2198_s17 + $0x10] sm:$0xff]  ;;  %1687 = vmatpush3.msra.mxu1 %v754_v36  ;;  %s1483_s15 = sshll.u32 %s216_s14, 8 }
  0x17   : > { %1633 = vmatpush3.msra.mxu0 %v260_v1  ;;  %1638 = vmatprep.mubr.msk.f32.mxu0 %vm269_vm0, %v226_v4  ;;  %v229_v7 = vld [vmem:[%s2198_s17 + $0x18] sm:$0xff]  ;;  %v230_v8 = vld [vmem:[%s2198_s17 + $0x20] sm:$0xff]  ;;  %v231_v9 = vld [vmem:[%s2198_s17 + $0x28] sm:$0xff]  ;;  %s2610_s16 = scalar_lea.vmem [#allocation2], %s1483_s15 }
  0x18   : > { %1634 = vmatprep.subr.mxu0 %v259_v2  ;;  %v232_v10 = vld [vmem:[%s2198_s17 + $0x30] sm:$0xff]  ;;  %v233_v11 = vld [vmem:[%s2198_s17 + $0x38] sm:$0xff]  ;;  %v234_v12 = vld [vmem:[%s2198_s17 + $0x40] sm:$0xff]  ;;  %1688 = vmatprep.subr.mxu1 %v753_v37  ;;  %s1417_s23 = sshll.u32 %s2610_s16, 4  ;;  %s2679_s23 = int_to_ptr.vmem [resolvable:$true] %s1417_s23 }
  0x19   : > { %1635 = vmatpush3.msra.mxu0 %v259_v2  ;;  %v235_v13 = vld [vmem:[%s2198_s17 + $0x48] sm:$0xff]  ;;  %v236_v14 = vld [vmem:[%s2198_s17 + $0x50] sm:$0xff]  ;;  %v237_v15 = vld [vmem:[%s2198_s17 + $0x58] sm:$0xff]  ;;  %1689 = vmatpush3.msra.mxu1 %v753_v37  ;;  %s2039_s6 = scalar_lea.vmem %s2679_s23, 4096  ;;  %p2046_p0 = scmp.lt.s32.totalorder %s2679_s23, %s2044_s8 }
  0x1a   : > { %1636 = vmatprep.subr.mxu0 %v258_v3  ;;  %v238_v16 = vld [vmem:[%s2198_s17 + $0x60] sm:$0xff]  ;;  %v239_v17 = vld [vmem:[%s2198_s17 + $0x68] sm:$0xff]  ;;  %v240_v18 = vld [vmem:[%s2198_s17 + $0x70] sm:$0xff]  ;;  %1690 = vmatprep.subr.mxu1 %v752_v38  ;;  %p2040_p11 = scmp.ne.s32.totalorder %s2679_s23, %s2039_s6  ;;  %p2047_p1 = scmp.lt.s32.totalorder %s2045_s9, %s2039_s6 }
  0x1b   : > { %1637 = vmatpush3.msra.mxu0 %v258_v3  ;;  %v241_v19 = vld [vmem:[%s2198_s17 + $0x78] sm:$0xff]  ;;  %v242_v20 = vld [vmem:[%s2198_s17 + $0x80] sm:$0xff]  ;;  %v243_v21 = vld [vmem:[%s2198_s17 + $0x88] sm:$0xff]  ;;  %1691 = vmatpush3.msra.mxu1 %v752_v38 }
  0x1c   : > { %1639 = vmatmul.mubr.msk.f32.vlgmr.msra.gmra.mxu0 %vm269_vm0, %v227_v5  ;;  %v244_v22 = vld [vmem:[%s2198_s17 + $0x90] sm:$0xff]  ;;  %v245_v23 = vld [vmem:[%s2198_s17 + $0x98] sm:$0xff]  ;;  %v246_v24 = vld [vmem:[%s2198_s17 + $0xa0] sm:$0xff]  ;;  %1692 = vmatprep.subr.mxu1 %v751_v39  ;;  %p2041_p12 = pnand %p2040_p11, %p2172_p5  ;;  %p2048_p2 = por %p2047_p1, %p2046_p0 }
  0x1d   : > { %1641 = vmatprep.mubr.msk.f32.mxu0 %vm269_vm0, %v228_v6  ;;  %v247_v25 = vld [vmem:[%s2198_s17 + $0xa8] sm:$0xff]  ;;  %v248_v26 = vld [vmem:[%s2198_s17 + $0xb0] sm:$0xff]  ;;  %v249_v27 = vld [vmem:[%s2198_s17 + $0xb8] sm:$0xff]  ;;  %1693 = vmatpush3.msra.mxu1 %v751_v39 }
  0x1e   : > { %v250_v28 = vld [vmem:[%s2198_s17 + $0xc0] sm:$0xff]  ;;  %v251_v29 = vld [vmem:[%s2198_s17 + $0xc8] sm:$0xff]  ;;  %v252_v30 = vld [vmem:[%s2198_s17 + $0xd0] sm:$0xff]  ;;  %p2042_p13 = pneg %p2041_p12 }
  0x1f   : > { %v253_v31 = vld [vmem:[%s2198_s17 + $0xd8] sm:$0xff]  ;;  %v254_v32 = vld [vmem:[%s2198_s17 + $0xe0] sm:$0xff]  ;;  %v255_v33 = vld [vmem:[%s2198_s17 + $0xe8] sm:$0xff] }
  0x20   : > { %1642 = vmatmul.mubr.msk.f32.gmra.mxu0 %vm269_vm0, %v229_v7  ;;  %v256_v34 = vld [vmem:[%s2198_s17 + $0xf0] sm:$0xff]  ;;  %v257_v35 = vld [vmem:[%s2198_s17 + $0xf8] sm:$0xff]  ;;  %v2279_v40 = vld [vmem:[%s2728_s2] ss:$0 sm:$0xff]  ;;  %s1557_s17 = sshll.u32 %s2155_s22, 12  ;;  %s2686_s22 = scalar_lea.sflag [#allocation3], %s216_s14 }
  0x21   : > { %1644 = vmatprep.mubr.msk.f32.mxu0 %vm269_vm0, %v230_v8  ;;  %s2677_s30 = scalar_lea.hbm %s2731_s5, %s1557_s17  ;;  %p2049_p3 = pnand %p2048_p2, %p2042_p13 }
  0x24   : > { %1645 = vmatmul.mubr.msk.f32.gmra.mxu0 %vm269_vm0, %v231_v9 }
  0x25   : > { %1647 = vmatprep.mubr.msk.f32.mxu0 %vm269_vm0, %v232_v10 }
  0x28   : > { %1648 = vmatmul.mubr.msk.f32.gmra.mxu0 %vm269_vm0, %v233_v11 }
  0x29   : > { %1650 = vmatprep.mubr.msk.f32.mxu0 %vm269_vm0, %v234_v12 }
  0x2c   : > { %1651 = vmatmul.mubr.msk.f32.gmra.mxu0 %vm269_vm0, %v235_v13 }
  0x2d   : > { %1653 = vmatprep.mubr.msk.f32.mxu0 %vm269_vm0, %v236_v14 }
  0x30   : > { %1654 = vmatmul.mubr.msk.f32.gmra.mxu0 %vm269_vm0, %v237_v15 }
  0x31   : > { %1656 = vmatprep.mubr.msk.f32.mxu0 %vm269_vm0, %v238_v16 }
  0x34   : > { %1657 = vmatmul.mubr.msk.f32.gmra.mxu0 %vm269_vm0, %v239_v17 }
  0x35   : > { %1659 = vmatprep.mubr.msk.f32.mxu0 %vm269_vm0, %v240_v18 }
  0x38   : > { %1660 = vmatmul.mubr.msk.f32.gmra.mxu0 %vm269_vm0, %v241_v19 }
  0x39   : > { %1662 = vmatprep.mubr.msk.f32.mxu0 %vm269_vm0, %v242_v20 }
  0x3c   : > { %1663 = vmatmul.mubr.msk.f32.gmra.mxu0 %vm269_vm0, %v243_v21 }
  0x3d   : > { %1665 = vmatprep.mubr.msk.f32.mxu0 %vm269_vm0, %v244_v22 }
  0x40   : > { %1666 = vmatmul.mubr.msk.f32.gmra.mxu0 %vm269_vm0, %v245_v23 }
  0x41   : > { %1668 = vmatprep.mubr.msk.f32.mxu0 %vm269_vm0, %v246_v24 }
  0x44   : > { %1669 = vmatmul.mubr.msk.f32.gmra.mxu0 %vm269_vm0, %v247_v25 }
  0x45   : > { %1671 = vmatprep.mubr.msk.f32.mxu0 %vm269_vm0, %v248_v26 }
  0x48   : > { %1672 = vmatmul.mubr.msk.f32.gmra.mxu0 %vm269_vm0, %v249_v27 }
  0x49   : > { %1674 = vmatprep.mubr.msk.f32.mxu0 %vm269_vm0, %v250_v28 }
  0x4c   : > { %1675 = vmatmul.mubr.msk.f32.gmra.mxu0 %vm269_vm0, %v251_v29 }
  0x4d   : > { %1677 = vmatprep.mubr.msk.f32.mxu0 %vm269_vm0, %v252_v30 }
  0x50   : > { %1678 = vmatmul.mubr.msk.f32.gmra.mxu0 %vm269_vm0, %v253_v31 }
  0x51   : > { %1680 = vmatprep.mubr.msk.f32.mxu0 %vm269_vm0, %v254_v32 }
  0x54   : > { %1681 = vmatmul.mubr.msk.f32.gmra.mxu0 %vm269_vm0, %v255_v33 }
  0x55   : > { %1683 = vmatprep.mubr.msk.f32.mxu0 %vm269_vm0, %v256_v34 }
  0x58   : > { %1684 = vmatmul.mubr.msk.f32.gmra.mxu0 %vm269_vm0, %v257_v35 }
  0xdc   : > { %v1640_v41 = vpop.f32.mrf.mxu0 }
  0xdd   : > { %v438_v42 = vadd.f32 %v1640_v41, %v2279_v40 }
  0xde   : > { %v432_v43 = vpop.f32.mrf.mxu0 }
  0xdf   : > { %v592_v44 = vsub.f32 0.0, %v438_v42  ;;  %v433_v45 = vadd.f32 %v2279_v40, %v432_v43 }
  0xe0   : > { %v1643_v46 = vpop.f32.mrf.mxu0 }
  0xe1   : > { %v625_v47 = vmul.f32 1.442695, %v592_v44  ;;  %v591_v48 = vsub.f32 0.0, %v433_v45  ;;  %v448_v49 = vadd.f32 %v1643_v46, %v2279_v40 }
  0xe2   : > { %v442_v50 = vpop.f32.mrf.mxu0 }
  0xe3   : > { %1783 = vpow2.f32 %v625_v47  ;;  %v623_v51 = vmul.f32 1.442695, %v591_v48  ;;  %v594_v52 = vsub.f32 0.0, %v448_v49  ;;  %v443_v53 = vadd.f32 %v2279_v40, %v442_v50 }
  0xe4   : > { %v1646_v54 = vpop.f32.mrf.mxu0 }
  0xe5   : > { %1785 = vpow2.f32 %v623_v51  ;;  %v629_v55 = vmul.f32 1.442695, %v594_v52  ;;  %v593_v56 = vsub.f32 0.0, %v443_v53  ;;  %v458_v57 = vadd.f32 %v1646_v54, %v2279_v40 }
  0xe6   : > { %v452_v58 = vpop.f32.mrf.mxu0 }
  0xe7   : > { %1787 = vpow2.f32 %v629_v55  ;;  %v627_v59 = vmul.f32 1.442695, %v593_v56  ;;  %v596_v60 = vsub.f32 0.0, %v458_v57  ;;  %v453_v61 = vadd.f32 %v2279_v40, %v452_v58 }
  0xe8   : > { %v1649_v62 = vpop.f32.mrf.mxu0 }
  0xe9   : > { %1789 = vpow2.f32 %v627_v59  ;;  %v633_v63 = vmul.f32 1.442695, %v596_v60  ;;  %v595_v0 = vsub.f32 0.0, %v453_v61  ;;  %v468_v1 = vadd.f32 %v1649_v62, %v2279_v40 }
  0xea   : > { %v462_v2 = vpop.f32.mrf.mxu0 }
  0xeb   : > { %1791 = vpow2.f32 %v633_v63  ;;  %v631_v3 = vmul.f32 1.442695, %v595_v0  ;;  %v598_v4 = vsub.f32 0.0, %v468_v1  ;;  %v463_v5 = vadd.f32 %v2279_v40, %v462_v2 }
  0xec   : > { %v1652_v6 = vpop.f32.mrf.mxu0 }
  0xed   : > { %1793 = vpow2.f32 %v631_v3  ;;  %v637_v7 = vmul.f32 1.442695, %v598_v4  ;;  %v597_v8 = vsub.f32 0.0, %v463_v5  ;;  %v478_v9 = vadd.f32 %v1652_v6, %v2279_v40 }
  0xee   : > { %v472_v10 = vpop.f32.mrf.mxu0 }
  0xef   : > { %1795 = vpow2.f32 %v637_v7  ;;  %v635_v11 = vmul.f32 1.442695, %v597_v8  ;;  %v600_v12 = vsub.f32 0.0, %v478_v9  ;;  %v473_v13 = vadd.f32 %v2279_v40, %v472_v10 }
  0xf0   : > { %v1784_v14 = vpop.eup %1783  ;;  %v1655_v15 = vpop.f32.mrf.mxu0 }
  0xf1   : > { %v688_v16 = vadd.f32 1.0, %v1784_v14  ;;  %1797 = vpow2.f32 %v635_v11  ;;  %v641_v17 = vmul.f32 1.442695, %v600_v12  ;;  %v599_v18 = vsub.f32 0.0, %v473_v13 }
  0xf2   : > { %v1786_v19 = vpop.eup %1785  ;;  %v488_v20 = vadd.f32 %v1655_v15, %v2279_v40  ;;  %v482_v21 = vpop.f32.mrf.mxu0 }
  0xf3   : > { %1799 = vrcp.f32 %v688_v16  ;;  %v687_v22 = vadd.f32 1.0, %v1786_v19  ;;  %v639_v23 = vmul.f32 1.442695, %v599_v18  ;;  %v483_v24 = vadd.f32 %v2279_v40, %v482_v21 }
  0xf4   : > { %v1788_v25 = vpop.eup %1787  ;;  %1801 = vpow2.f32 %v641_v17  ;;  %v602_v26 = vsub.f32 0.0, %v488_v20  ;;  %v1658_v27 = vpop.f32.mrf.mxu0 }
  0xf5   : > { %1803 = vrcp.f32 %v687_v22  ;;  %v690_v28 = vadd.f32 1.0, %v1788_v25  ;;  %v601_v29 = vsub.f32 0.0, %v483_v24  ;;  %v498_v30 = vadd.f32 %v1658_v27, %v2279_v40 }
  0xf6   : > { %v1790_v31 = vpop.eup %1789  ;;  %1805 = vpow2.f32 %v639_v23  ;;  %v645_v32 = vmul.f32 1.442695, %v602_v26  ;;  %v492_v33 = vpop.f32.mrf.mxu0 }
  0xf7   : > { %1807 = vrcp.f32 %v690_v28  ;;  %v689_v34 = vadd.f32 1.0, %v1790_v31  ;;  %v643_v35 = vmul.f32 1.442695, %v601_v29  ;;  %v604_v36 = vsub.f32 0.0, %v498_v30 }
  0xf8   : > { %v1792_v37 = vpop.eup %1791  ;;  %1809 = vpow2.f32 %v645_v32  ;;  %v493_v38 = vadd.f32 %v2279_v40, %v492_v33  ;;  %v1661_v39 = vpop.f32.mrf.mxu0 }
  0xf9   : > { %1811 = vrcp.f32 %v689_v34  ;;  %v692_v41 = vadd.f32 1.0, %v1792_v37  ;;  %v649_v42 = vmul.f32 1.442695, %v604_v36  ;;  %v508_v43 = vadd.f32 %v1661_v39, %v2279_v40 }
  0xfa   : > { %v1794_v44 = vpop.eup %1793  ;;  %1813 = vpow2.f32 %v643_v35  ;;  %v603_v45 = vsub.f32 0.0, %v493_v38  ;;  %v502_v46 = vpop.f32.mrf.mxu0 }
  0xfb   : > { %1815 = vrcp.f32 %v692_v41  ;;  %v691_v47 = vadd.f32 1.0, %v1794_v44  ;;  %v606_v48 = vsub.f32 0.0, %v508_v43  ;;  %v503_v49 = vadd.f32 %v2279_v40, %v502_v46 }
  0xfc   : > { %v1796_v50 = vpop.eup %1795  ;;  %1817 = vpow2.f32 %v649_v42  ;;  %v647_v51 = vmul.f32 1.442695, %v603_v45  ;;  %v1664_v52 = vpop.f32.mrf.mxu0 }
  0xfd   : > { %1819 = vrcp.f32 %v691_v47  ;;  %v694_v53 = vadd.f32 1.0, %v1796_v50  ;;  %v653_v54 = vmul.f32 1.442695, %v606_v48  ;;  %v605_v55 = vsub.f32 0.0, %v503_v49 }
  0xfe   : > { %v1798_v56 = vpop.eup %1797  ;;  %1821 = vpow2.f32 %v647_v51  ;;  %v518_v57 = vadd.f32 %v1664_v52, %v2279_v40  ;;  %v512_v58 = vpop.f32.mrf.mxu0 }
  0xff   : > { %1823 = vrcp.f32 %v694_v53  ;;  %v693_v59 = vadd.f32 1.0, %v1798_v56  ;;  %v651_v60 = vmul.f32 1.442695, %v605_v55  ;;  %v513_v61 = vadd.f32 %v2279_v40, %v512_v58 }
 0x100   : > { %v1800_v62 = vpop.eup %1799  ;;  %1825 = vpow2.f32 %v653_v54  ;;  %v608_v63 = vsub.f32 0.0, %v518_v57  ;;  %v1667_v0 = vpop.f32.mrf.mxu0 }
 0x101   : > { %v1802_v1 = vpop.eup %1801  ;;  %1827 = vrcp.f32 %v693_v59  ;;  %v607_v2 = vsub.f32 0.0, %v513_v61  ;;  %v528_v3 = vadd.f32 %v1667_v0, %v2279_v40 }
 0x102   : > { %v1804_v4 = vpop.eup %1803  ;;  %v696_v5 = vadd.f32 1.0, %v1802_v1  ;;  %1829 = vpow2.f32 %v651_v60  ;;  %v657_v6 = vmul.f32 1.442695, %v608_v63  ;;  %v522_v7 = vpop.f32.mrf.mxu0 }
 0x103   : > { %v1806_v8 = vpop.eup %1805  ;;  %v655_v9 = vmul.f32 1.442695, %v607_v2  ;;  %v610_v10 = vsub.f32 0.0, %v528_v3  ;;  %v523_v11 = vadd.f32 %v2279_v40, %v522_v7  ;;  %1694 = vmatprep.mubr.msk.f32.mxu1 %vm269_vm0, %v1804_v4 }
 0x104   : > { %v1808_v12 = vpop.eup %1807  ;;  %1831 = vrcp.f32 %v696_v5  ;;  %v695_v13 = vadd.f32 1.0, %v1806_v8  ;;  %v1670_v14 = vpop.f32.mrf.mxu0  ;;  %1695 = vmatmul.mubr.msk.f32.vlgmr.msra.gmra.mxu1 %vm269_vm0, %v1800_v62 }
 0x105   : > { %v1810_v15 = vpop.eup %1809  ;;  %1833 = vpow2.f32 %v657_v6  ;;  %v661_v16 = vmul.f32 1.442695, %v610_v10  ;;  %v609_v17 = vsub.f32 0.0, %v523_v11  ;;  %v538_v18 = vadd.f32 %v1670_v14, %v2279_v40 }
 0x106   : > { %v1812_v19 = vpop.eup %1811  ;;  %1835 = vrcp.f32 %v695_v13  ;;  %v698_v20 = vadd.f32 1.0, %v1810_v15  ;;  %v532_v21 = vpop.f32.mrf.mxu0 }
 0x107   : > { %v1814_v22 = vpop.eup %1813  ;;  %1837 = vpow2.f32 %v655_v9  ;;  %v659_v23 = vmul.f32 1.442695, %v609_v17  ;;  %v612_v24 = vsub.f32 0.0, %v538_v18  ;;  %v533_v25 = vadd.f32 %v2279_v40, %v532_v21  ;;  %1697 = vmatprep.mubr.msk.f32.mxu1 %vm269_vm0, %v1812_v19 }
 0x108   : > { %v1816_v26 = vpop.eup %1815  ;;  %1839 = vrcp.f32 %v698_v20  ;;  %v697_v27 = vadd.f32 1.0, %v1814_v22  ;;  %v1673_v28 = vpop.f32.mrf.mxu0  ;;  %1698 = vmatmul.mubr.msk.f32.gmra.mxu1 %vm269_vm0, %v1808_v12 }
 0x109   : > { %v1818_v29 = vpop.eup %1817  ;;  %1841 = vpow2.f32 %v661_v16  ;;  %v665_v30 = vmul.f32 1.442695, %v612_v24  ;;  %v611_v31 = vsub.f32 0.0, %v533_v25  ;;  %v548_v32 = vadd.f32 %v1673_v28, %v2279_v40 }
 0x10a   : > { %v1820_v33 = vpop.eup %1819  ;;  %1843 = vrcp.f32 %v697_v27  ;;  %v700_v34 = vadd.f32 1.0, %v1818_v29  ;;  %v542_v35 = vpop.f32.mrf.mxu0 }
 0x10b   : > { %v1822_v36 = vpop.eup %1821  ;;  %1845 = vpow2.f32 %v659_v23  ;;  %v663_v37 = vmul.f32 1.442695, %v611_v31  ;;  %v614_v38 = vsub.f32 0.0, %v548_v32  ;;  %v543_v39 = vadd.f32 %v2279_v40, %v542_v35  ;;  %1700 = vmatprep.mubr.msk.f32.mxu1 %vm269_vm0, %v1820_v33 }
 0x10c   : > { %v1824_v41 = vpop.eup %1823  ;;  %1847 = vrcp.f32 %v700_v34  ;;  %v699_v42 = vadd.f32 1.0, %v1822_v36  ;;  %v1676_v43 = vpop.f32.mrf.mxu0  ;;  %1701 = vmatmul.mubr.msk.f32.gmra.mxu1 %vm269_vm0, %v1816_v26 }
 0x10d   : > { %v1826_v44 = vpop.eup %1825  ;;  %1849 = vpow2.f32 %v665_v30  ;;  %v669_v45 = vmul.f32 1.442695, %v614_v38  ;;  %v613_v46 = vsub.f32 0.0, %v543_v39  ;;  %v558_v47 = vadd.f32 %v1676_v43, %v2279_v40 }
 0x10e   : > { %v1828_v48 = vpop.eup %1827  ;;  %1851 = vrcp.f32 %v699_v42  ;;  %v702_v49 = vadd.f32 1.0, %v1826_v44  ;;  %v552_v50 = vpop.f32.mrf.mxu0 }
 0x10f   : > { %v1830_v51 = vpop.eup %1829  ;;  %1853 = vpow2.f32 %v663_v37  ;;  %v667_v52 = vmul.f32 1.442695, %v613_v46  ;;  %v616_v53 = vsub.f32 0.0, %v558_v47  ;;  %v553_v54 = vadd.f32 %v2279_v40, %v552_v50  ;;  %1703 = vmatprep.mubr.msk.f32.mxu1 %vm269_vm0, %v1828_v48 }
 0x110   : > { %1855 = vrcp.f32 %v702_v49  ;;  %v701_v55 = vadd.f32 1.0, %v1830_v51  ;;  %v1679_v56 = vpop.f32.mrf.mxu0  ;;  %1704 = vmatmul.mubr.msk.f32.gmra.mxu1 %vm269_vm0, %v1824_v41 }
 0x111   : > { %v1832_v57 = vpop.eup %1831  ;;  %1857 = vpow2.f32 %v669_v45  ;;  %v673_v58 = vmul.f32 1.442695, %v616_v53  ;;  %v615_v59 = vsub.f32 0.0, %v553_v54  ;;  %v568_v60 = vadd.f32 %v1679_v56, %v2279_v40 }
 0x112   : > { %v1834_v61 = vpop.eup %1833  ;;  %1859 = vrcp.f32 %v701_v55  ;;  %v562_v62 = vpop.f32.mrf.mxu0 }
 0x113   : > { %v1836_v63 = vpop.eup %1835  ;;  %v704_v0 = vadd.f32 1.0, %v1834_v61  ;;  %1861 = vpow2.f32 %v667_v52  ;;  %v671_v1 = vmul.f32 1.442695, %v615_v59  ;;  %v618_v2 = vsub.f32 0.0, %v568_v60 }
 0x114   : > { %v1838_v3 = vpop.eup %1837  ;;  %1863 = vpow2.f32 %v673_v58  ;;  %v563_v4 = vadd.f32 %v2279_v40, %v562_v62  ;;  %1706 = vmatprep.mubr.msk.f32.mxu1 %vm269_vm0, %v1836_v63  ;;  %v1682_v5 = vpop.f32.mrf.mxu0 }
 0x115   : > { %v1840_v6 = vpop.eup %1839  ;;  %1865 = vrcp.f32 %v704_v0  ;;  %v703_v7 = vadd.f32 1.0, %v1838_v3  ;;  %v677_v8 = vmul.f32 1.442695, %v618_v2  ;;  %v578_v9 = vadd.f32 %v1682_v5, %v2279_v40  ;;  %1707 = vmatmul.mubr.msk.f32.gmra.mxu1 %vm269_vm0, %v1832_v57 }
 0x116   : > { %v1842_v10 = vpop.eup %1841  ;;  %1867 = vpow2.f32 %v671_v1  ;;  %v617_v11 = vsub.f32 0.0, %v563_v4  ;;  %v572_v12 = vpop.f32.mrf.mxu0 }
 0x117   : > { %v1844_v13 = vpop.eup %1843  ;;  %1869 = vrcp.f32 %v703_v7  ;;  %v706_v14 = vadd.f32 1.0, %v1842_v10  ;;  %v620_v15 = vsub.f32 0.0, %v578_v9  ;;  %v573_v16 = vadd.f32 %v2279_v40, %v572_v12 }
 0x118   : > { %v1846_v17 = vpop.eup %1845  ;;  %1871 = vpow2.f32 %v677_v8  ;;  %v675_v18 = vmul.f32 1.442695, %v617_v11  ;;  %1709 = vmatprep.mubr.msk.f32.mxu1 %vm269_vm0, %v1844_v13  ;;  %v1685_v19 = vpop.f32.mrf.mxu0  ;;  %v2348_v11 = vld [vmem:[%s2730_s4] ss:$0 sm:$0xff] }
 0x119   : > { %v1848_v20 = vpop.eup %1847  ;;  %1873 = vrcp.f32 %v706_v14  ;;  %v705_v21 = vadd.f32 1.0, %v1846_v17  ;;  %v681_v22 = vmul.f32 1.442695, %v620_v15  ;;  %v619_v23 = vsub.f32 0.0, %v573_v16  ;;  %1710 = vmatmul.mubr.msk.f32.gmra.mxu1 %vm269_vm0, %v1840_v6 }
 0x11a   : > { %v1850_v24 = vpop.eup %1849  ;;  %1875 = vpow2.f32 %v675_v18  ;;  %v588_v25 = vadd.f32 %v1685_v19, %v2279_v40  ;;  %v582_v26 = vpop.f32.mrf.mxu0 }
 0x11b   : > { %v1852_v27 = vpop.eup %1851  ;;  %1877 = vrcp.f32 %v705_v21  ;;  %v708_v28 = vadd.f32 1.0, %v1850_v24  ;;  %v679_v29 = vmul.f32 1.442695, %v619_v23  ;;  %v583_v30 = vadd.f32 %v2279_v40, %v582_v26 }
 0x11c   : > { %v1854_v31 = vpop.eup %1853  ;;  %1879 = vpow2.f32 %v681_v22  ;;  %v622_v32 = vsub.f32 0.0, %v588_v25  ;;  %1712 = vmatprep.mubr.msk.f32.mxu1 %vm269_vm0, %v1852_v27 }
 0x11d   : > { %v1856_v33 = vpop.eup %1855  ;;  %1881 = vrcp.f32 %v708_v28  ;;  %v707_v34 = vadd.f32 1.0, %v1854_v31  ;;  %v621_v35 = vsub.f32 0.0, %v583_v30  ;;  %1713 = vmatmul.mubr.msk.f32.gmra.mxu1 %vm269_vm0, %v1848_v20 }
 0x11e   : > { %v1858_v36 = vpop.eup %1857  ;;  %1883 = vpow2.f32 %v679_v29  ;;  %v685_v37 = vmul.f32 1.442695, %v622_v32 }
 0x11f   : > { %v1860_v38 = vpop.eup %1859  ;;  %1885 = vrcp.f32 %v707_v34  ;;  %v710_v39 = vadd.f32 1.0, %v1858_v36  ;;  %v683_v41 = vmul.f32 1.442695, %v621_v35 }
 0x120   : > { %v1862_v42 = vpop.eup %1861  ;;  %1887 = vpow2.f32 %v685_v37  ;;  %1715 = vmatprep.mubr.msk.f32.mxu1 %vm269_vm0, %v1860_v38 }
 0x121   : > { %v1864_v40 = vpop.eup %1863  ;;  %1889 = vrcp.f32 %v710_v39  ;;  %v709_v43 = vadd.f32 1.0, %v1862_v42  ;;  %1716 = vmatmul.mubr.msk.f32.gmra.mxu1 %vm269_vm0, %v1856_v33 }
 0x122   : > { %v1866_v44 = vpop.eup %1865  ;;  %v712_v45 = vadd.f32 1.0, %v1864_v40  ;;  %1891 = vpow2.f32 %v683_v41 }
 0x123   : > { %v1868_v46 = vpop.eup %1867  ;;  %1893 = vrcp.f32 %v709_v43 }
 0x124   : > { %v1870_v47 = vpop.eup %1869  ;;  %v711_v48 = vadd.f32 1.0, %v1868_v46  ;;  %1895 = vrcp.f32 %v712_v45 }
 0x125   : > { %v1872_v49 = vpop.eup %1871  ;;  %1718 = vmatprep.mubr.msk.f32.mxu1 %vm269_vm0, %v1870_v47 }
 0x126   : > { %v1874_v50 = vpop.eup %1873  ;;  %1897 = vrcp.f32 %v711_v48  ;;  %v714_v51 = vadd.f32 1.0, %v1872_v49  ;;  %1719 = vmatmul.mubr.msk.f32.gmra.mxu1 %vm269_vm0, %v1866_v44 }
 0x127   : > { %v1876_v52 = vpop.eup %1875 }
 0x128   : > { %v1878_v53 = vpop.eup %1877  ;;  %v713_v54 = vadd.f32 1.0, %v1876_v52  ;;  %1899 = vrcp.f32 %v714_v51 }
 0x129   : > { %v1880_v55 = vpop.eup %1879  ;;  %1721 = vmatprep.mubr.msk.f32.mxu1 %vm269_vm0, %v1878_v53 }
 0x12a   : > { %v1882_v56 = vpop.eup %1881  ;;  %1901 = vrcp.f32 %v713_v54  ;;  %v716_v57 = vadd.f32 1.0, %v1880_v55  ;;  %1722 = vmatmul.mubr.msk.f32.gmra.mxu1 %vm269_vm0, %v1874_v50 }
 0x12b   : > { %v1884_v58 = vpop.eup %1883 }
 0x12c   : > { %v1886_v59 = vpop.eup %1885  ;;  %v715_v60 = vadd.f32 1.0, %v1884_v58  ;;  %1903 = vrcp.f32 %v716_v57 }
 0x12d   : > { %v1888_v61 = vpop.eup %1887  ;;  %1724 = vmatprep.mubr.msk.f32.mxu1 %vm269_vm0, %v1886_v59 }
 0x12e   : > { %v1890_v62 = vpop.eup %1889  ;;  %1905 = vrcp.f32 %v715_v60  ;;  %v718_v63 = vadd.f32 1.0, %v1888_v61  ;;  %1725 = vmatmul.mubr.msk.f32.gmra.mxu1 %vm269_vm0, %v1882_v56 }
 0x12f   : > { %v1892_v0 = vpop.eup %1891 }
 0x130   : > { %v1894_v1 = vpop.eup %1893  ;;  %v717_v2 = vadd.f32 1.0, %v1892_v0  ;;  %1907 = vrcp.f32 %v718_v63 }
 0x131   : > { %1727 = vmatprep.mubr.msk.f32.mxu1 %vm269_vm0, %v1894_v1  ;;  %v1896_v3 = vpop.eup %1895 }
 0x132   : > { %1909 = vrcp.f32 %v717_v2  ;;  %1728 = vmatmul.mubr.msk.f32.gmra.mxu1 %vm269_vm0, %v1890_v62 }
 0x133   : > { %v1898_v4 = vpop.eup %1897 }
 0x134   : > { %1730 = vmatprep.mubr.msk.f32.mxu1 %vm269_vm0, %v1898_v4 }
 0x135   : > { %v1900_v5 = vpop.eup %1899 }
 0x136   : > { %1731 = vmatmul.mubr.msk.f32.gmra.mxu1 %vm269_vm0, %v1896_v3 }
 0x137   : > { %v1902_v6 = vpop.eup %1901 }
 0x138   : > { %1733 = vmatprep.mubr.msk.f32.mxu1 %vm269_vm0, %v1902_v6 }
 0x139   : > { %v1904_v7 = vpop.eup %1903 }
 0x13a   : > { %1734 = vmatmul.mubr.msk.f32.gmra.mxu1 %vm269_vm0, %v1900_v5 }
 0x13b   : > { %v1906_v8 = vpop.eup %1905 }
 0x13c   : > { %1736 = vmatprep.mubr.msk.f32.mxu1 %vm269_vm0, %v1906_v8 }
 0x13d   : > { %v1908_v9 = vpop.eup %1907 }
 0x13e   : > { %1737 = vmatmul.mubr.msk.f32.gmra.mxu1 %vm269_vm0, %v1904_v7 }
 0x13f   : > { %v1910_v10 = vpop.eup %1909 }
 0x140   : > { %1739 = vmatprep.mubr.msk.f32.mxu1 %vm269_vm0, %v1910_v10 }
 0x142   : > { %1740 = vmatmul.mubr.msk.f32.gmra.mxu1 %vm269_vm0, %v1908_v9 }
 0x1c4   : > { %v1696_v12 = vpop.f32.mrf.mxu1 }
 0x1c5   : > { %v2351_v13 = vadd.f32 %v1696_v12, %v2348_v11 }
 0x1c6   : > { %v924_v14 = vpop.f32.mrf.mxu1 }
 0x1c7   : > { %1085 = vmax.xlane.f32.xlu0 %v2351_v13  ;;  %v2355_v16 = vadd.f32 %v2348_v11, %v924_v14 }
 0x1c8   : > { %v1699_v15 = vpop.f32.mrf.mxu1 }
 0x1c9   : > { %v2358_v17 = vadd.f32 %v1699_v15, %v2348_v11 }
 0x1ca   : > { %v934_v18 = vpop.f32.mrf.mxu1 }
 0x1cb   : > { %1089 = vmax.xlane.f32.xlu1 %v2358_v17  ;;  %1083 = vmax.xlane.f32.xlu0 %v2355_v16  ;;  %v2363_v20 = vadd.f32 %v2348_v11, %v934_v18 }
 0x1cc   : > { %v1702_v19 = vpop.f32.mrf.mxu1 }
 0x1cd   : > { %v2370_v24 = vadd.f32 %v1702_v19, %v2348_v11 }
 0x1ce   : > { %v944_v21 = vpop.f32.mrf.mxu1 }
 0x1cf   : > { %v2366_v22 = vadd.f32 %v2348_v11, %v944_v21  ;;  %1087 = vmax.xlane.f32.xlu1 %v2363_v20 }
 0x1d0   : > { %v1705_v23 = vpop.f32.mrf.mxu1 }
 0x1d1   : > { %1091 = vmax.xlane.f32.xlu0 %v2366_v22  ;;  %v2378_v27 = vadd.f32 %v1705_v23, %v2348_v11 }
 0x1d2   : > { %v954_v25 = vpop.f32.mrf.mxu1 }
 0x1d3   : > { %v2374_v26 = vadd.f32 %v2348_v11, %v954_v25  ;;  %1093 = vmax.xlane.f32.xlu1 %v2370_v24 }
 0x1d5   : > { %v1708_v28 = vpop.f32.mrf.mxu1  ;;  %1095 = vmax.xlane.f32.xlu0 %v2374_v26 }
 0x1d6   : > { %v2386_v31 = vadd.f32 %v1708_v28, %v2348_v11 }
 0x1d7   : > { %v964_v29 = vpop.f32.mrf.mxu1  ;;  %1097 = vmax.xlane.f32.xlu1 %v2378_v27 }
 0x1d8   : > { %v2383_v30 = vadd.f32 %v2348_v11, %v964_v29 }
 0x1d9   : > { %v1711_v32 = vpop.f32.mrf.mxu1 }
 0x1da   : > { %1099 = vmax.xlane.f32.xlu0 %v2383_v30  ;;  %v2394_v35 = vadd.f32 %v1711_v32, %v2348_v11 }
 0x1db   : > { %v974_v33 = vpop.f32.mrf.mxu1  ;;  %1101 = vmax.xlane.f32.xlu1 %v2386_v31 }
 0x1dc   : > { %v2391_v34 = vadd.f32 %v2348_v11, %v974_v33 }
 0x1dd   : > { %v1714_v36 = vpop.f32.mrf.mxu1 }
 0x1de   : > { %1103 = vmax.xlane.f32.xlu0 %v2391_v34  ;;  %v2402_v39 = vadd.f32 %v1714_v36, %v2348_v11 }
 0x1df   : > { %v984_v37 = vpop.f32.mrf.mxu1  ;;  %1105 = vmax.xlane.f32.xlu1 %v2394_v35 }
 0x1e0   : > { %v2399_v38 = vadd.f32 %v2348_v11, %v984_v37 }
 0x1e1   : > { %v1717_v41 = vpop.f32.mrf.mxu1 }
 0x1e2   : > { %1107 = vmax.xlane.f32.xlu0 %v2399_v38  ;;  %v2410_v43 = vadd.f32 %v1717_v41, %v2348_v11 }
 0x1e3   : > { %v994_v42 = vpop.f32.mrf.mxu1  ;;  %1109 = vmax.xlane.f32.xlu1 %v2402_v39 }
 0x1e4   : > { %v2407_v40 = vadd.f32 %v2348_v11, %v994_v42 }
 0x1e6   : > { %v1720_v44 = vpop.f32.mrf.mxu1  ;;  %1111 = vmax.xlane.f32.xlu0 %v2407_v40 }
 0x1e7   : > { %1113 = vmax.xlane.f32.xlu1 %v2410_v43  ;;  %v2415_v46 = vadd.f32 %v1720_v44, %v2348_v11 }
 0x1e8   : > { %v1004_v45 = vpop.f32.mrf.mxu1 }
 0x1e9   : > { %v2418_v47 = vadd.f32 %v2348_v11, %v1004_v45 }
 0x1ea   : > { %v1723_v48 = vpop.f32.mrf.mxu1 }
 0x1eb   : > { %1115 = vmax.xlane.f32.xlu0 %v2418_v47  ;;  %1117 = vmax.xlane.f32.xlu1 %v2415_v46  ;;  %v2423_v50 = vadd.f32 %v1723_v48, %v2348_v11 }
 0x1ec   : > { %v1014_v49 = vpop.f32.mrf.mxu1 }
 0x1ed   : > { %v2426_v51 = vadd.f32 %v2348_v11, %v1014_v49 }
 0x1ee   : > { %v1726_v52 = vpop.f32.mrf.mxu1 }
 0x1ef   : > { %1119 = vmax.xlane.f32.xlu0 %v2426_v51  ;;  %1121 = vmax.xlane.f32.xlu1 %v2423_v50  ;;  %v2431_v54 = vadd.f32 %v1726_v52, %v2348_v11 }
 0x1f0   : > { %v1024_v53 = vpop.f32.mrf.mxu1 }
 0x1f1   : > { %v2434_v55 = vadd.f32 %v2348_v11, %v1024_v53 }
 0x1f2   : > { %v1729_v56 = vpop.f32.mrf.mxu1 }
 0x1f3   : > { %1123 = vmax.xlane.f32.xlu0 %v2434_v55  ;;  %1125 = vmax.xlane.f32.xlu1 %v2431_v54  ;;  %v2439_v58 = vadd.f32 %v1729_v56, %v2348_v11 }
 0x1f4   : > { %v1034_v57 = vpop.f32.mrf.mxu1 }
 0x1f5   : > { %v2442_v59 = vadd.f32 %v2348_v11, %v1034_v57 }
 0x1f6   : > { %v1732_v60 = vpop.f32.mrf.mxu1 }
 0x1f7   : > { %1127 = vmax.xlane.f32.xlu0 %v2442_v59  ;;  %1129 = vmax.xlane.f32.xlu1 %v2439_v58  ;;  %v2447_v62 = vadd.f32 %v1732_v60, %v2348_v11 }
 0x1f8   : > { %v1044_v61 = vpop.f32.mrf.mxu1 }
 0x1f9   : > { %v2450_v63 = vadd.f32 %v2348_v11, %v1044_v61 }
 0x1fa   : > { %v1735_v0 = vpop.f32.mrf.mxu1 }
 0x1fb   : > { %1131 = vmax.xlane.f32.xlu0 %v2450_v63  ;;  %1133 = vmax.xlane.f32.xlu1 %v2447_v62  ;;  %v2455_v2 = vadd.f32 %v1735_v0, %v2348_v11 }
 0x1fc   : > { %v1054_v1 = vpop.f32.mrf.mxu1 }
 0x1fd   : > { %v2458_v3 = vadd.f32 %v2348_v11, %v1054_v1 }
 0x1fe   : > { %v1738_v4 = vpop.f32.mrf.mxu1 }
 0x1ff   : > { %1135 = vmax.xlane.f32.xlu0 %v2458_v3  ;;  %1137 = vmax.xlane.f32.xlu1 %v2455_v2  ;;  %v2463_v6 = vadd.f32 %v1738_v4, %v2348_v11 }
 0x200   : > { %v1064_v5 = vpop.f32.mrf.mxu1 }
 0x201   : > { %v2466_v7 = vadd.f32 %v2348_v11, %v1064_v5 }
 0x202   : > { %v1741_v8 = vpop.f32.mrf.mxu1 }
 0x203   : > { %1139 = vmax.xlane.f32.xlu0 %v2466_v7  ;;  %1141 = vmax.xlane.f32.xlu1 %v2463_v6  ;;  %v2471_v10 = vadd.f32 %v1741_v8, %v2348_v11 }
 0x204   : > { %v1074_v9 = vpop.f32.mrf.mxu1 }
 0x205   : > { %v2474_v12 = vadd.f32 %v2348_v11, %v1074_v9 }
 0x207   : > { %1143 = vmax.xlane.f32.xlu0 %v2474_v12  ;;  %1145 = vmax.xlane.f32.xlu1 %v2471_v10 }
 0x250   : > { %v1086_v14 = vpop.xlane.xlu0 %1085 }
 0x251   : > { %v1148_v15 = vsub.f32 %v2351_v13, %v1086_v14 }
 0x253   : > { %v1181_v18 = vmul.f32 1.442695, %v1148_v15 }
 0x254   : > { %v1090_v19 = vpop.xlane.xlu1 %1089  ;;  %v1084_v21 = vpop.xlane.xlu0 %1083 }
 0x255   : > { %1911 = vpow2.f32 %v1181_v18  ;;  %v1150_v23 = vsub.f32 %v2358_v17, %v1090_v19  ;;  %v1147_v25 = vsub.f32 %v2355_v16, %v1084_v21 }
 0x257   : > { %v1185_v28 = vmul.f32 1.442695, %v1150_v23  ;;  %v1179_v29 = vmul.f32 1.442695, %v1147_v25 }
 0x258   : > { %v1088_v32 = vpop.xlane.xlu1 %1087 }
 0x259   : > { %1913 = vpow2.f32 %v1185_v28  ;;  %v1149_v11 = vsub.f32 %v2363_v20, %v1088_v32 }
 0x25a   : > { %1915 = vpow2.f32 %v1179_v29  ;;  %v1092_v33 = vpop.xlane.xlu0 %1091 }
 0x25b   : > { %v1183_v36 = vmul.f32 1.442695, %v1149_v11  ;;  %v1151_v37 = vsub.f32 %v2366_v22, %v1092_v33 }
 0x25c   : > { %v1094_v13 = vpop.xlane.xlu1 %1093 }
 0x25d   : > { %1917 = vpow2.f32 %v1183_v36  ;;  %v1152_v41 = vsub.f32 %v2370_v24, %v1094_v13  ;;  %v1187_v42 = vmul.f32 1.442695, %v1151_v37 }
 0x25e   : > { %v1096_v44 = vpop.xlane.xlu0 %1095 }
 0x25f   : > { %v1189_v17 = vmul.f32 1.442695, %v1152_v41  ;;  %v1153_v16 = vsub.f32 %v2374_v26, %v1096_v44 }
 0x260   : > { %v1098_v45 = vpop.xlane.xlu1 %1097 }
 0x261   : > { %1919 = vpow2.f32 %v1189_v17  ;;  %v1154_v48 = vsub.f32 %v2378_v27, %v1098_v45  ;;  %v1191_v20 = vmul.f32 1.442695, %v1153_v16 }
 0x262   : > { %v2486_v49 = vpop.eup %1911  ;;  %1921 = vpow2.f32 %v1187_v42 }
 0x263   : > { %v1193_v52 = vmul.f32 1.442695, %v1154_v48  ;;  %v1100_v53 = vpop.xlane.xlu0 %1099  ;;  %1245 = vadd.xlane.f32.xlu1 %v2486_v49 }
 0x264   : > { %v1155_v22 = vsub.f32 %v2383_v30, %v1100_v53  ;;  %v1102_v24 = vpop.xlane.xlu1 %1101 }
 0x265   : > { %1923 = vpow2.f32 %v1193_v52  ;;  %v1156_v56 = vsub.f32 %v2386_v31, %v1102_v24 }
 0x266   : > { %v2491_v57 = vpop.eup %1913  ;;  %1925 = vpow2.f32 %v1191_v20  ;;  %v1195_v26 = vmul.f32 1.442695, %v1155_v22 }
 0x267   : > { %v2493_v60 = vpop.eup %1915  ;;  %v1197_v27 = vmul.f32 1.442695, %v1156_v56  ;;  %v1104_v61 = vpop.xlane.xlu0 %1103  ;;  %1249 = vadd.xlane.f32.xlu1 %v2491_v57 }
 0x268   : > { %v1157_v0 = vsub.f32 %v2391_v34, %v1104_v61  ;;  %1243 = vadd.xlane.f32.xlu0 %v2493_v60  ;;  %v1106_v1 = vpop.xlane.xlu1 %1105 }
 0x269   : > { %1927 = vpow2.f32 %v1197_v27  ;;  %v1158_v30 = vsub.f32 %v2394_v35, %v1106_v1 }
 0x26a   : > { %v2499_v4 = vpop.eup %1917  ;;  %1929 = vpow2.f32 %v1195_v26  ;;  %v1199_v31 = vmul.f32 1.442695, %v1157_v0 }
 0x26b   : > { %v1201_v5 = vmul.f32 1.442695, %v1158_v30  ;;  %v1108_v8 = vpop.xlane.xlu0 %1107 }
 0x26c   : > { %v1159_v9 = vsub.f32 %v2399_v38, %v1108_v8  ;;  %1247 = vadd.xlane.f32.xlu0 %v2499_v4  ;;  %v1110_v14 = vpop.xlane.xlu1 %1109 }
 0x26d   : > { %1931 = vpow2.f32 %v1201_v5  ;;  %v1160_v34 = vsub.f32 %v2402_v39, %v1110_v14 }
 0x26e   : > { %v2504_v15 = vpop.eup %1919  ;;  %1933 = vpow2.f32 %v1199_v31  ;;  %v1203_v18 = vmul.f32 1.442695, %v1159_v9 }
 0x26f   : > { %v2506_v19 = vpop.eup %1921  ;;  %v1205_v35 = vmul.f32 1.442695, %v1160_v34  ;;  %v1112_v21 = vpop.xlane.xlu0 %1111  ;;  %1253 = vadd.xlane.f32.xlu1 %v2504_v15 }
 0x270   : > { %v1161_v23 = vsub.f32 %v2407_v40, %v1112_v21  ;;  %1251 = vadd.xlane.f32.xlu0 %v2506_v19  ;;  %v1114_v38 = vpop.xlane.xlu1 %1113 }
 0x271   : > { %1935 = vpow2.f32 %v1205_v35  ;;  %v1162_v25 = vsub.f32 %v2410_v43, %v1114_v38 }
 0x272   : > { %v2512_v28 = vpop.eup %1923  ;;  %1937 = vpow2.f32 %v1203_v18  ;;  %v1207_v39 = vmul.f32 1.442695, %v1161_v23 }
 0x273   : > { %v2514_v29 = vpop.eup %1925  ;;  %v1209_v32 = vmul.f32 1.442695, %v1162_v25  ;;  %1257 = vadd.xlane.f32.xlu1 %v2512_v28 }
 0x274   : > { %v1116_v11 = vpop.xlane.xlu0 %1115  ;;  %1255 = vadd.xlane.f32.xlu0 %v2514_v29  ;;  %v1118_v33 = vpop.xlane.xlu1 %1117 }
 0x275   : > { %1939 = vpow2.f32 %v1209_v32  ;;  %v1163_v40 = vsub.f32 %v2418_v47, %v1116_v11  ;;  %v1164_v36 = vsub.f32 %v2415_v46, %v1118_v33 }
 0x276   : > { %v2520_v37 = vpop.eup %1927  ;;  %1941 = vpow2.f32 %v1207_v39 }
 0x277   : > { %v2522_v43 = vpop.eup %1929  ;;  %v1211_v13 = vmul.f32 1.442695, %v1163_v40  ;;  %v1213_v41 = vmul.f32 1.442695, %v1164_v36  ;;  %1261 = vadd.xlane.f32.xlu1 %v2520_v37 }
 0x278   : > { %v1120_v42 = vpop.xlane.xlu0 %1119  ;;  %1259 = vadd.xlane.f32.xlu0 %v2522_v43  ;;  %v1122_v44 = vpop.xlane.xlu1 %1121 }
 0x279   : > { %1943 = vpow2.f32 %v1211_v13  ;;  %v1165_v17 = vsub.f32 %v2426_v51, %v1120_v42  ;;  %v1166_v47 = vsub.f32 %v2423_v50, %v1122_v44 }
 0x27a   : > { %v2528_v16 = vpop.eup %1931  ;;  %1945 = vpow2.f32 %v1213_v41 }
 0x27b   : > { %v2530_v46 = vpop.eup %1933  ;;  %v1215_v45 = vmul.f32 1.442695, %v1165_v17  ;;  %v1217_v48 = vmul.f32 1.442695, %v1166_v47  ;;  %1265 = vadd.xlane.f32.xlu1 %v2528_v16 }
 0x27c   : > { %v1124_v20 = vpop.xlane.xlu0 %1123  ;;  %1263 = vadd.xlane.f32.xlu0 %v2530_v46  ;;  %v1126_v52 = vpop.xlane.xlu1 %1125 }
 0x27d   : > { %1947 = vpow2.f32 %v1215_v45  ;;  %v1167_v53 = vsub.f32 %v2434_v55, %v1124_v20  ;;  %v1168_v51 = vsub.f32 %v2431_v54, %v1126_v52 }
 0x27e   : > { %v2536_v22 = vpop.eup %1935  ;;  %1949 = vpow2.f32 %v1217_v48 }
 0x27f   : > { %v2538_v50 = vpop.eup %1937  ;;  %v1219_v24 = vmul.f32 1.442695, %v1167_v53  ;;  %v1221_v56 = vmul.f32 1.442695, %v1168_v51  ;;  %1269 = vadd.xlane.f32.xlu1 %v2536_v22 }
 0x280   : > { %v1128_v26 = vpop.xlane.xlu0 %1127  ;;  %1267 = vadd.xlane.f32.xlu0 %v2538_v50  ;;  %v1130_v27 = vpop.xlane.xlu1 %1129 }
 0x281   : > { %1951 = vpow2.f32 %v1219_v24  ;;  %v1169_v61 = vsub.f32 %v2442_v59, %v1128_v26  ;;  %v1170_v55 = vsub.f32 %v2439_v58, %v1130_v27 }
 0x282   : > { %v2544_v0 = vpop.eup %1939  ;;  %1953 = vpow2.f32 %v1221_v56 }
 0x283   : > { %v2546_v54 = vpop.eup %1941  ;;  %v1223_v1 = vmul.f32 1.442695, %v1169_v61  ;;  %v1225_v30 = vmul.f32 1.442695, %v1170_v55  ;;  %1273 = vadd.xlane.f32.xlu1 %v2544_v0 }
 0x284   : > { %v1132_v31 = vpop.xlane.xlu0 %1131  ;;  %1271 = vadd.xlane.f32.xlu0 %v2546_v54  ;;  %v1134_v5 = vpop.xlane.xlu1 %1133 }
 0x285   : > { %1955 = vpow2.f32 %v1223_v1  ;;  %v1171_v8 = vsub.f32 %v2450_v63, %v1132_v31  ;;  %v1172_v59 = vsub.f32 %v2447_v62, %v1134_v5 }
 0x286   : > { %v2552_v9 = vpop.eup %1943  ;;  %1957 = vpow2.f32 %v1225_v30 }
 0x287   : > { %v2554_v58 = vpop.eup %1945  ;;  %v1227_v14 = vmul.f32 1.442695, %v1171_v8  ;;  %v1229_v34 = vmul.f32 1.442695, %v1172_v59 }
 0x288   : > { %v1136_v18 = vpop.xlane.xlu0 %1135  ;;  %1277 = vadd.xlane.f32.xlu1 %v2554_v58  ;;  %1275 = vadd.xlane.f32.xlu0 %v2552_v9  ;;  %v1138_v35 = vpop.xlane.xlu1 %1137 }
 0x289   : > { %1959 = vpow2.f32 %v1227_v14  ;;  %v1173_v21 = vsub.f32 %v2458_v3, %v1136_v18  ;;  %v1174_v63 = vsub.f32 %v2455_v2, %v1138_v35 }
 0x28a   : > { %v2560_v23 = vpop.eup %1947  ;;  %1961 = vpow2.f32 %v1229_v34 }
 0x28b   : > { %v2562_v62 = vpop.eup %1949  ;;  %v1231_v38 = vmul.f32 1.442695, %v1173_v21  ;;  %v1233_v25 = vmul.f32 1.442695, %v1174_v63 }
 0x28c   : > { %v1140_v39 = vpop.xlane.xlu0 %1139  ;;  %1281 = vadd.xlane.f32.xlu1 %v2562_v62  ;;  %1279 = vadd.xlane.f32.xlu0 %v2560_v23  ;;  %v1142_v32 = vpop.xlane.xlu1 %1141 }
 0x28d   : > { %1963 = vpow2.f32 %v1231_v38  ;;  %v1175_v11 = vsub.f32 %v2466_v7, %v1140_v39  ;;  %v1176_v3 = vsub.f32 %v2463_v6, %v1142_v32 }
 0x28e   : > { %v2568_v33 = vpop.eup %1951  ;;  %1965 = vpow2.f32 %v1233_v25 }
 0x28f   : > { %v2570_v2 = vpop.eup %1953  ;;  %v1235_v40 = vmul.f32 1.442695, %v1175_v11  ;;  %v1237_v36 = vmul.f32 1.442695, %v1176_v3 }
 0x290   : > { %v1144_v13 = vpop.xlane.xlu0 %1143  ;;  %1285 = vadd.xlane.f32.xlu1 %v2570_v2  ;;  %1283 = vadd.xlane.f32.xlu0 %v2568_v33  ;;  %v1146_v41 = vpop.xlane.xlu1 %1145 }
 0x291   : > { %1967 = vpow2.f32 %v1235_v40  ;;  %v1177_v42 = vsub.f32 %v2474_v12, %v1144_v13  ;;  %v1178_v7 = vsub.f32 %v2471_v10, %v1146_v41 }
 0x292   : > { %v2576_v44 = vpop.eup %1955  ;;  %1969 = vpow2.f32 %v1237_v36 }
 0x293   : > { %v2578_v6 = vpop.eup %1957  ;;  %v1239_v17 = vmul.f32 1.442695, %v1177_v42  ;;  %v1241_v47 = vmul.f32 1.442695, %v1178_v7 }
 0x294   : > { %1289 = vadd.xlane.f32.xlu1 %v2578_v6  ;;  %1287 = vadd.xlane.f32.xlu0 %v2576_v44 }
 0x295   : > { %1971 = vpow2.f32 %v1239_v17 }
 0x296   : > { %v2582_v45 = vpop.eup %1959  ;;  %1973 = vpow2.f32 %v1241_v47 }
 0x297   : > { %v2584_v48 = vpop.eup %1961 }
 0x298   : > { %1293 = vadd.xlane.f32.xlu1 %v2584_v48  ;;  %1291 = vadd.xlane.f32.xlu0 %v2582_v45 }
 0x29a   : > { %v2588_v10 = vpop.eup %1963 }
 0x29b   : > { %v2590_v12 = vpop.eup %1965 }
 0x29c   : > { %1297 = vadd.xlane.f32.xlu1 %v2590_v12  ;;  %1295 = vadd.xlane.f32.xlu0 %v2588_v10 }
 0x29e   : > { %v2594_v20 = vpop.eup %1967 }
 0x29f   : > { %v2596_v52 = vpop.eup %1969 }
 0x2a0   : > { %1301 = vadd.xlane.f32.xlu1 %v2596_v52  ;;  %1299 = vadd.xlane.f32.xlu0 %v2594_v20 }
 0x2a2   : > { %v2600_v53 = vpop.eup %1971 }
 0x2a3   : > { %v2602_v51 = vpop.eup %1973 }
 0x2a4   : > { %1305 = vadd.xlane.f32.xlu1 %v2602_v51  ;;  %1303 = vadd.xlane.f32.xlu0 %v2600_v53 }
 0x2ec   : > { %v1246_v24 = vpop.xlane.xlu1 %1245 }
 0x2ed   : > { %1975 = vrcp.f32 %v1246_v24 }
 0x2f0   : > { %v1250_v56 = vpop.xlane.xlu1 %1249 }
 0x2f1   : > { %1977 = vrcp.f32 %v1250_v56  ;;  %v1244_v26 = vpop.xlane.xlu0 %1243 }
 0x2f2   : > { %1979 = vrcp.f32 %v1244_v26 }
 0x2f5   : > { %v1248_v27 = vpop.xlane.xlu0 %1247 }
 0x2f6   : > { %1981 = vrcp.f32 %v1248_v27 }
 0x2f8   : > { %v1254_v61 = vpop.xlane.xlu1 %1253 }
 0x2f9   : > { %1983 = vrcp.f32 %v1254_v61  ;;  %v1252_v55 = vpop.xlane.xlu0 %1251 }
 0x2fa   : > { %v1976_v1 = vpop.eup %1975  ;;  %1985 = vrcp.f32 %v1252_v55 }
 0x2fb   : > { %v1340_v30 = vmul.f32 %v1976_v1, %v2486_v49 }
 0x2fc   : > { %v1258_v31 = vpop.xlane.xlu1 %1257 }
 0x2fd   : > { %1372 = vst [vmem:[%s2610_s16 + $0x8] sm:$0xff] %v1340_v30  ;;  %1987 = vrcp.f32 %v1258_v31  ;;  %v1256_v5 = vpop.xlane.xlu0 %1255 }
 0x2fe   : > { %v1978_v8 = vpop.eup %1977  ;;  %1989 = vrcp.f32 %v1256_v5 }
 0x2ff   : > { %v1980_v59 = vpop.eup %1979  ;;  %v1342_v14 = vmul.f32 %v1978_v8, %v2491_v57 }
 0x300   : > { %v1339_v34 = vmul.f32 %v1980_v59, %v2493_v60  ;;  %v1262_v18 = vpop.xlane.xlu1 %1261 }
 0x301   : > { %1374 = vst [vmem:[%s2610_s16 + $0x18] sm:$0xff] %v1342_v14  ;;  %1991 = vrcp.f32 %v1262_v18  ;;  %v1260_v49 = vpop.xlane.xlu0 %1259 }
 0x302   : > { %1371 = vst [vmem:[%s2610_s16] sm:$0xff] %v1339_v34  ;;  %1993 = vrcp.f32 %v1260_v49 }
 0x303   : > { %v1982_v35 = vpop.eup %1981 }
 0x304   : > { %v1341_v21 = vmul.f32 %v1982_v35, %v2499_v4  ;;  %v1266_v63 = vpop.xlane.xlu1 %1265 }
 0x305   : > { %1995 = vrcp.f32 %v1266_v63  ;;  %v1264_v38 = vpop.xlane.xlu0 %1263 }
 0x306   : > { %v1984_v25 = vpop.eup %1983  ;;  %1373 = vst [vmem:[%s2610_s16 + $0x10] sm:$0xff] %v1341_v21  ;;  %1997 = vrcp.f32 %v1264_v38 }
 0x307   : > { %v1986_v57 = vpop.eup %1985  ;;  %v1344_v60 = vmul.f32 %v1984_v25, %v2504_v15 }
 0x308   : > { %v1343_v39 = vmul.f32 %v1986_v57, %v2506_v19  ;;  %v1270_v32 = vpop.xlane.xlu1 %1269 }
 0x309   : > { %1376 = vst [vmem:[%s2610_s16 + $0x28] sm:$0xff] %v1344_v60  ;;  %1999 = vrcp.f32 %v1270_v32  ;;  %v1268_v11 = vpop.xlane.xlu0 %1267 }
 0x30a   : > { %v1988_v3 = vpop.eup %1987  ;;  %1375 = vst [vmem:[%s2610_s16 + $0x20] sm:$0xff] %v1343_v39  ;;  %2001 = vrcp.f32 %v1268_v11 }
 0x30b   : > { %v1990_v4 = vpop.eup %1989  ;;  %v1346_v40 = vmul.f32 %v1988_v3, %v2512_v28 }
 0x30c   : > { %v1345_v36 = vmul.f32 %v1990_v4, %v2514_v29  ;;  %v1274_v13 = vpop.xlane.xlu1 %1273 }
 0x30d   : > { %1378 = vst [vmem:[%s2610_s16 + $0x38] sm:$0xff] %v1346_v40  ;;  %2003 = vrcp.f32 %v1274_v13  ;;  %v1272_v15 = vpop.xlane.xlu0 %1271 }
 0x30e   : > { %v1992_v19 = vpop.eup %1991  ;;  %1377 = vst [vmem:[%s2610_s16 + $0x30] sm:$0xff] %v1345_v36  ;;  %2005 = vrcp.f32 %v1272_v15 }
 0x30f   : > { %v1994_v41 = vpop.eup %1993  ;;  %v1348_v42 = vmul.f32 %v1992_v19, %v2520_v37 }
 0x310   : > { %v1347_v7 = vmul.f32 %v1994_v41, %v2522_v43 }
 0x311   : > { %1380 = vst [vmem:[%s2610_s16 + $0x48] sm:$0xff] %v1348_v42  ;;  %v1278_v17 = vpop.xlane.xlu1 %1277  ;;  %v1276_v28 = vpop.xlane.xlu0 %1275 }
 0x312   : > { %v1996_v47 = vpop.eup %1995  ;;  %1379 = vst [vmem:[%s2610_s16 + $0x40] sm:$0xff] %v1347_v7  ;;  %2007 = vrcp.f32 %v1278_v17 }
 0x313   : > { %v1998_v29 = vpop.eup %1997  ;;  %v1350_v24 = vmul.f32 %v1996_v47, %v2528_v16  ;;  %2009 = vrcp.f32 %v1276_v28 }
 0x314   : > { %v1349_v56 = vmul.f32 %v1998_v29, %v2530_v46 }
 0x315   : > { %1382 = vst [vmem:[%s2610_s16 + $0x58] sm:$0xff] %v1350_v24  ;;  %v1282_v26 = vpop.xlane.xlu1 %1281  ;;  %v1280_v37 = vpop.xlane.xlu0 %1279 }
 0x316   : > { %v2000_v27 = vpop.eup %1999  ;;  %1381 = vst [vmem:[%s2610_s16 + $0x50] sm:$0xff] %v1349_v56  ;;  %2011 = vrcp.f32 %v1282_v26 }
 0x317   : > { %v2002_v43 = vpop.eup %2001  ;;  %v1352_v61 = vmul.f32 %v2000_v27, %v2536_v22  ;;  %2013 = vrcp.f32 %v1280_v37 }
 0x318   : > { %v1351_v55 = vmul.f32 %v2002_v43, %v2538_v50 }
 0x319   : > { %1384 = vst [vmem:[%s2610_s16 + $0x68] sm:$0xff] %v1352_v61  ;;  %v1286_v16 = vpop.xlane.xlu1 %1285  ;;  %v1284_v1 = vpop.xlane.xlu0 %1283 }
 0x31a   : > { %v2004_v30 = vpop.eup %2003  ;;  %1383 = vst [vmem:[%s2610_s16 + $0x60] sm:$0xff] %v1351_v55  ;;  %2015 = vrcp.f32 %v1286_v16 }
 0x31b   : > { %v2006_v46 = vpop.eup %2005  ;;  %v1354_v31 = vmul.f32 %v2004_v30, %v2544_v0  ;;  %2017 = vrcp.f32 %v1284_v1 }
 0x31c   : > { %v1353_v5 = vmul.f32 %v2006_v46, %v2546_v54 }
 0x31d   : > { %1386 = vst [vmem:[%s2610_s16 + $0x78] sm:$0xff] %v1354_v31  ;;  %v1290_v22 = vpop.xlane.xlu1 %1289  ;;  %v1288_v8 = vpop.xlane.xlu0 %1287 }
 0x31e   : > { %1385 = vst [vmem:[%s2610_s16 + $0x70] sm:$0xff] %v1353_v5  ;;  %2019 = vrcp.f32 %v1290_v22 }
 0x31f   : > { %v2008_v50 = vpop.eup %2007  ;;  %2021 = vrcp.f32 %v1288_v8 }
 0x320   : > { %v2010_v59 = vpop.eup %2009  ;;  %v1356_v14 = vmul.f32 %v2008_v50, %v2554_v58 }
 0x321   : > { %v1355_v34 = vmul.f32 %v2010_v59, %v2552_v9  ;;  %v1294_v18 = vpop.xlane.xlu1 %1293  ;;  %v1292_v0 = vpop.xlane.xlu0 %1291 }
 0x322   : > { %1388 = vst [vmem:[%s2610_s16 + $0x88] sm:$0xff] %v1356_v14  ;;  %2023 = vrcp.f32 %v1294_v18 }
 0x323   : > { %v2012_v54 = vpop.eup %2011  ;;  %1387 = vst [vmem:[%s2610_s16 + $0x80] sm:$0xff] %v1355_v34  ;;  %2025 = vrcp.f32 %v1292_v0 }
 0x324   : > { %v2014_v49 = vpop.eup %2013  ;;  %v1358_v35 = vmul.f32 %v2012_v54, %v2562_v62 }
 0x325   : > { %v1357_v21 = vmul.f32 %v2014_v49, %v2560_v23  ;;  %v1298_v63 = vpop.xlane.xlu1 %1297  ;;  %v1296_v38 = vpop.xlane.xlu0 %1295 }
 0x326   : > { %1390 = vst [vmem:[%s2610_s16 + $0x98] sm:$0xff] %v1358_v35  ;;  %2027 = vrcp.f32 %v1298_v63 }
 0x327   : > { %v2016_v9 = vpop.eup %2015  ;;  %1389 = vst [vmem:[%s2610_s16 + $0x90] sm:$0xff] %v1357_v21  ;;  %2029 = vrcp.f32 %v1296_v38 }
 0x328   : > { %v2018_v58 = vpop.eup %2017  ;;  %v1360_v25 = vmul.f32 %v2016_v9, %v2570_v2 }
 0x329   : > { %v1359_v57 = vmul.f32 %v2018_v58, %v2568_v33  ;;  %v1302_v60 = vpop.xlane.xlu1 %1301  ;;  %v1300_v39 = vpop.xlane.xlu0 %1299 }
 0x32a   : > { %1392 = vst [vmem:[%s2610_s16 + $0xa8] sm:$0xff] %v1360_v25  ;;  %2031 = vrcp.f32 %v1302_v60 }
 0x32b   : > { %v2020_v23 = vpop.eup %2019  ;;  %1391 = vst [vmem:[%s2610_s16 + $0xa0] sm:$0xff] %v1359_v57  ;;  %2033 = vrcp.f32 %v1300_v39 }
 0x32c   : > { %v2022_v62 = vpop.eup %2021  ;;  %v1362_v32 = vmul.f32 %v2020_v23, %v2578_v6 }
 0x32d   : > { %v1361_v11 = vmul.f32 %v2022_v62, %v2576_v44  ;;  %v1306_v3 = vpop.xlane.xlu1 %1305  ;;  %v1304_v2 = vpop.xlane.xlu0 %1303 }
 0x32e   : > { %1394 = vst [vmem:[%s2610_s16 + $0xb8] sm:$0xff] %v1362_v32  ;;  %2035 = vrcp.f32 %v1306_v3 }
 0x32f   : > { %v2024_v33 = vpop.eup %2023  ;;  %1393 = vst [vmem:[%s2610_s16 + $0xb0] sm:$0xff] %v1361_v11  ;;  %2037 = vrcp.f32 %v1304_v2 }
 0x330   : > { %v2026_v4 = vpop.eup %2025  ;;  %v1364_v40 = vmul.f32 %v2024_v33, %v2584_v48 }
 0x331   : > { %v1363_v36 = vmul.f32 %v2026_v4, %v2582_v45 }
 0x332   : > { %1396 = vst [vmem:[%s2610_s16 + $0xc8] sm:$0xff] %v1364_v40 }
 0x333   : > { %v2028_v44 = vpop.eup %2027  ;;  %1395 = vst [vmem:[%s2610_s16 + $0xc0] sm:$0xff] %v1363_v36 }
 0x334   : > { %v2030_v6 = vpop.eup %2029  ;;  %v1366_v13 = vmul.f32 %v2028_v44, %v2590_v12 }
 0x335   : > { %v1365_v15 = vmul.f32 %v2030_v6, %v2588_v10 }
 0x336   : > { %1398 = vst [vmem:[%s2610_s16 + $0xd8] sm:$0xff] %v1366_v13 }
 0x337   : > { %v2032_v19 = vpop.eup %2031  ;;  %1397 = vst [vmem:[%s2610_s16 + $0xd0] sm:$0xff] %v1365_v15 }
 0x338   : > { %v2034_v41 = vpop.eup %2033  ;;  %v1368_v48 = vmul.f32 %v2032_v19, %v2596_v52 }
 0x339   : > { %v1367_v45 = vmul.f32 %v2034_v41, %v2594_v20 }
 0x33a   : > { %1400 = vst [vmem:[%s2610_s16 + $0xe8] sm:$0xff] %v1368_v48 }
 0x33b   : > { %v2036_v42 = vpop.eup %2035  ;;  %1399 = vst [vmem:[%s2610_s16 + $0xe0] sm:$0xff] %v1367_v45 }
 0x33c   : > { %v2038_v12 = vpop.eup %2037  ;;  %v1370_v10 = vmul.f32 %v2036_v42, %v2602_v51 }
 0x33d   : > { %v1369_v20 = vmul.f32 %v2038_v12, %v2600_v53 }
 0x33e   : > { %1402 = vst [vmem:[%s2610_s16 + $0xf8] sm:$0xff] %v1370_v10 }
 0x33f   : > { %1401 = vst [vmem:[%s2610_s16 + $0xf0] sm:$0xff] %v1369_v20 }
 0x340   : > { %2052 = shalt.err (!%p2049_p3)
}
 0x341   : > { %s2053_s10 = scalar_lea.hbm %s2677_s30, 4096  ;;  %s2057_s13 = scalar_lea.hbm %s2731_s5, 8192 }
 0x342   : > { %p2054_p4 = scmp.ne.s32.totalorder %s2677_s30, %s2053_s10  ;;  %p2058_p9 = scmp.lt.s32.totalorder %s2677_s30, %s2731_s5 }
 0x343   : > { %p2059_p10 = scmp.lt.s32.totalorder %s2057_s13, %s2053_s10 }
 0x344   : > { %p2055_p7 = pnand %p2054_p4, %p2172_p5 }
 0x345   : > { %p2060_p11 = por %p2059_p10, %p2058_p9 }
 0x346   : > { %p2056_p8 = pneg %p2055_p7 }
 0x348   : > { %p2061_p12 = pnand %p2060_p11, %p2056_p8 }
 0x34a   : > { %2064 = shalt.err (!%p2061_p12)
}
 0x34b   : > { %s2102_s16 = smov 128   ;;  %s2103_s17 = smov 8  }
 0x34c   : > { %1742 = dma.vmem_to_hbm [thread:$0]  (%p2172_p5), %s2679_s23, 4096, %s2677_s30, %s2686_s22, %s2102_s16, %s2102_s16, %s2103_s17  }
 0x34d PF: > { %p1748_p13 = scmp.ge.s32.totalorder %s2099_s21, 2  ;;  %s1432_s25 = sand.u32 1, %s2087_s18  }
 0x34e   : > { %s1433_s26 = scalar_lea.sflag [#allocation3], %s1432_s25 }
 0x34f   : > { %p1745_p0 = pnand %p1748_p13, %p2176_p6 }
 0x351   : > { %p1746_p1 = pneg %p1745_p0 }
 0x353   : > { %2082 = dma.done.wait (%p1746_p1), %s1433_s26, 4096  }
 0x354   : > { %2084 = vsyncadd (%p1746_p1), %s1433_s26, 4294963200  ;;  %p15_p2 = scmp.ge.s32.totalorder %s2159_s24, 4   ;;  %s2734_s18 = smov %s2091_s19 }
 0x355   : > { %s2735_s19 = smov %s2095_s20  ;;  %s2736_s20 = smov %s2170_s27 }
 0x356   : > { %s2737_s21 = smov %s2159_s24  ;;  %17 = sbr.rel (!%p15_p2) target bundleno = 3 (0x3), region = 75 }
 0x35b   :  { %1438 = vsyncpa [#allocation3], 1 }
 0x35c   :  { %1440 = vsyncpa [#allocation3 + $0x1], 1 }

</bundles_post_ra>
